<compile_context>
chip_gen: v5e
topology: v5e:2x2
jax: 0.10.0
libtpu: 0.0.40
codegen_flags: <defaults>
</compile_context>

<pallas_src>
import functools
import math

import jax
import jax.numpy as jnp
from jax.experimental import pallas as pl
from jax.experimental.pallas import tpu as pltpu


def attn_dropout_kernel(u_ref, x_ref, o_ref, *, p_drop):
    # u_ref: (row_block, 1) f32 uniform draws, one per row of this block.
    # drop_i = (u_i < p_drop)  <=>  Bernoulli(p_drop) per row.
    drop = u_ref[...] < jnp.float32(p_drop)            # (rb, 1) predicate
    # Broadcasting select: whole row -> -inf where dropped, passthrough otherwise.
    o_ref[...] = jnp.where(drop, jnp.float32(-jnp.inf), x_ref[...]).astype(o_ref.dtype)


def _pick_row_block(n_rows, n_feat, dtype_bytes=4, target_bytes=1 << 20):
    """Largest row block that (a) divides n_rows, (b) is a multiple of 8, and
    (c) keeps one (row_block, n_feat) block near ~1 MiB.  Keeps >= 2 grid steps
    when possible so v7x's two TensorCores both get work."""
    if n_rows % 8 != 0:
        return n_rows                                  # full-dim block (always legal)
    max_rows = max(8, min(n_rows, target_bytes // max(1, n_feat * dtype_bytes)))
    rb = (max_rows // 8) * 8
    while rb > 8 and n_rows % rb != 0:
        rb -= 8
    if rb < 8 or n_rows % rb != 0:
        rb = 8
    if n_rows // rb < 2:                               # keep >= 2 steps for v7x
        half = rb // 2
        if half >= 8 and n_rows % half == 0:
            rb = half
    return rb


def attn_dropout(x, key, *, p_drop=0.1, training=True):
    """Row dropout-to--inf along dim 0 of x (AttnDropout.forward).

    Training: each index along dim 0 is independently set to -inf (the whole
    slice) with probability p_drop.  Eval: identity, no kernel launch.
    """
    if not training:
        return x                                       # nn.Identity path

    orig_shape = x.shape
    n_rows = orig_shape[0]
    n_feat = int(math.prod(orig_shape[1:])) if len(orig_shape) > 1 else 1
    x2 = x.reshape(n_rows, n_feat)

    # One uniform draw per row, computed with jax.random (portable; the TPU
    # hardware PRNG has no interpret-mode lowering).
    # TODO(synk): torch.distributions.Bernoulli CPU sampling is replaced by
    # jax.random, so masks are key-reproducible but not bit-identical to PyTorch.
    u = jax.random.uniform(key, (n_rows, 1), dtype=jnp.float32)

    row_block = _pick_row_block(n_rows, n_feat, dtype_bytes=x2.dtype.itemsize)
    grid = (n_rows // row_block,)

    kernel = functools.partial(attn_dropout_kernel, p_drop=float(p_drop))
    out2 = pl.pallas_call(
        kernel,
        out_shape=jax.ShapeDtypeStruct((n_rows, n_feat), x2.dtype),
        grid=grid,
        in_specs=[
            pl.BlockSpec((row_block, 1), lambda i: (i, 0)),       # per-row draws
            pl.BlockSpec((row_block, n_feat), lambda i: (i, 0)),  # lane-dense x slab
        ],
        out_specs=pl.BlockSpec((row_block, n_feat), lambda i: (i, 0)),
        compiler_params=pltpu.CompilerParams(
            dimension_semantics=("parallel",)),        # lets v7x shard rows across TCs
    )(u, x2)
    return out2.reshape(orig_shape)


if __name__ == "__main__":
    R, D = 128, 32                                     # small shapes, row-masked features
    x = jax.random.normal(jax.random.PRNGKey(0), (R, D), jnp.float32)
    drop_key = jax.random.PRNGKey(42)

    out = jax.block_until_ready(attn_dropout(x, drop_key, p_drop=0.1, training=True))
    assert out.shape == x.shape

    # Structural checks: every row is either untouched or entirely -inf.
    dropped = jnp.all(jnp.isneginf(out), axis=1)
    kept_ok = jnp.all(out == x, axis=1)
    assert bool(jnp.all(dropped | kept_ok))
    frac = float(jnp.mean(dropped.astype(jnp.float32)))
    assert frac < 0.6, frac                            # Bernoulli(0.1) over 128 rows

    # Same key -> same mask (deterministic).
    out2 = jax.block_until_ready(attn_dropout(x, drop_key, p_drop=0.1, training=True))
    assert bool(jnp.all(out == out2))

    # Eval mode is the identity (nn.Identity path of the module).
    assert bool(jnp.all(attn_dropout(x, drop_key, training=False) == x))

    print("KERNEL_OK")
</pallas_src>

<mosaic_0001>
module attributes {stable_mosaic.version = 11 : i64} {
  func.func @attn_dropout_kernel(%arg0: i32, %arg1: memref<64x1xf32, #tpu.memory_space<vmem>>, %arg2: memref<64x32xf32, #tpu.memory_space<vmem>>, %arg3: memref<64x32xf32, #tpu.memory_space<vmem>>) attributes {dimension_semantics = [#tpu.dimension_semantics<parallel>], iteration_bounds = array<i64: 2>, scalar_prefetch = 0 : i64, scratch_operands = 0 : i64, tpu.core_type = #tpu.core_type<tc>, window_params = [{transform_indices = @transform_0, window_bounds = array<i64: 64, 1>}, {transform_indices = @transform_1, window_bounds = array<i64: 64, 32>}, {transform_indices = @transform_2, window_bounds = array<i64: 64, 32>}]} {
    %c0 = arith.constant 0 : index
    %c0_0 = arith.constant 0 : index
    %0 = vector.load %arg1[%c0, %c0_0] : memref<64x1xf32, #tpu.memory_space<vmem>>, vector<64x1xf32>
    %cst = arith.constant 1.000000e-01 : f32
    %1 = vector.broadcast %cst : f32 to vector<64x1xf32>
    %2 = arith.cmpf olt, %0, %1 : vector<64x1xf32>
    %c0_1 = arith.constant 0 : index
    %c0_2 = arith.constant 0 : index
    %3 = vector.load %arg2[%c0_1, %c0_2] : memref<64x32xf32, #tpu.memory_space<vmem>>, vector<64x32xf32>
    %cst_3 = arith.constant 0xFF800000 : f32
    %4 = vector.shape_cast %2 : vector<64x1xi1> to vector<64x1xi1>
    %5 = vector.broadcast %4 : vector<64x1xi1> to vector<64x32xi1>
    %6 = vector.broadcast %cst_3 : f32 to vector<64x32xf32>
    %7 = arith.select %5, %6, %3 : vector<64x32xi1>, vector<64x32xf32>
    %c0_4 = arith.constant 0 : index
    %c0_5 = arith.constant 0 : index
    %8 = vector.load %arg3[%c0_4, %c0_5] : memref<64x32xf32, #tpu.memory_space<vmem>>, vector<64x32xf32>
    tpu.vector_store %arg3[%c0_4, %c0_5], %7 {strides = array<i32>} : memref<64x32xf32, #tpu.memory_space<vmem>>, vector<64x32xf32>,
    return
  }
  func.func @transform_0(%arg0: i32) -> (i32, i32) {
    %c0_i32 = arith.constant 0 : i32
    %c0_i32_0 = arith.constant 0 : i32
    return %arg0, %c0_i32 : i32, i32
  }
  func.func @transform_1(%arg0: i32) -> (i32, i32) {
    %c0_i32 = arith.constant 0 : i32
    %c0_i32_0 = arith.constant 0 : i32
    return %arg0, %c0_i32 : i32, i32
  }
  func.func @transform_2(%arg0: i32) -> (i32, i32) {
    %c0_i32 = arith.constant 0 : i32
    %c0_i32_0 = arith.constant 0 : i32
    return %arg0, %c0_i32 : i32, i32
  }
}

</mosaic_0001>

<bundles_post_ra>
// kernel: tpu_custom_call.1
= control target key start
LH: loop header
LB: loop body
LE: loop exit
PB: predicated region body
PF: predicated region fallthrough
CT: control target
= control target key end

     0   :  { %s367_s9 = smov 0   ;;  %s420_s0 = inlined_call_operand.vmem [shape: f32[128,1], index: 0, kind: input, shape index: {}]   ;;  %s421_s1 = inlined_call_operand.vmem [shape: f32[128,32], index: 1, kind: input, shape index: {}]   ;;  %s422_s2 = inlined_call_operand.vmem [shape: f32[128,32], index: 2, kind: output, shape index: {}]  }
   0x1 LB: > { %s318_s10 = sadd.s32 4294967295, %s349_s9   ;;  %p322_p0 = scmp.ge.s32.totalorder %s349_s9, 1  ;;  %s349_s9 = sphi %s367_s9, %s12_s9  }
   0x2   : > { %p124_p1 = scmp.lt.s32.totalorder %s349_s9, 3 }
   0x4   : > { %p125_p2 = pnand %p322_p0, %p124_p1 }
   0x5   : > { %s323_s11 = sshll.u32 (!%p125_p2), %s318_s10, 3 }
   0x6   : > { %128 = sbr.rel (%p125_p2) target bundleno = 152 (0x98), region = 28  ;;  %p152_p3 = scmp.lt.s32.totalorder (!%p125_p2), %s323_s11, 15 }
   0xb   : > { %v351_v0 = vmov 0   ;;  %s424_s11 = smov (!%p152_p3, %s323_s11), 15  ;;  %vm241_vm9 = vcmask 261120  }
   0xc   : > { %341 = vset.pattern.permute.xlu1 %v351_v0  ;;  %340 = vset.pattern.permute.xlu0 %v351_v0  ;;  %s375_s12 = sshll.u32 %s424_s11, 3 }
   0xd   : > { %342 = vset.pattern.permute.xlu2 %v351_v0  ;;  %s155_s15 = scalar_lea.vmem %s420_s0, %s375_s12  ;;  %s385_s18 = scalar_lea.vmem %s421_s1, %s375_s12 }
   0xe   : > { %v171_v1 = vld [vmem:[%s155_s15 + $0x10] sm:$0xff]  ;;  %v169_v2 = vld [vmem:[%s155_s15] sm:$0xff]  ;;  %v172_v5 = vld [vmem:[%s155_s15 + $0x18] sm:$0xff]  ;;  %s392_s21 = scalar_lea.vmem %s422_s2, %s375_s12 }
   0xf   : > { %vm179_vm0 = vcmp.lt.f32.partialorder %v171_v1, 0.1  ;;  %vm177_vm1 = vcmp.lt.f32.partialorder %v169_v2, 0.1  ;;  %v170_v6 = vld [vmem:[%s155_s15 + $0x8] sm:$0xff]  ;;  %v173_v7 = vld [vmem:[%s155_s15 + $0x20] sm:$0xff] }
  0x10   : > { %v195_v3 = vsel %vm179_vm0, 1, %v351_v0  ;;  %v193_v4 = vsel %vm177_vm1, 1, %v351_v0  ;;  %vm180_vm2 = vcmp.lt.f32.partialorder %v172_v5, 0.1  ;;  %vm178_vm3 = vcmp.lt.f32.partialorder %v170_v6, 0.1 }
  0x11   : > { %208 = vperm.xlu1 %341, %v195_v3   ;;  %202 = vperm.xlu0 %340, %v193_v4   ;;  %vm181_vm4 = vcmp.lt.f32.partialorder %v173_v7, 0.1  ;;  %v174_v9 = vld [vmem:[%s155_s15 + $0x28] sm:$0xff]  ;;  %v196_v10 = vsel %vm180_vm2, 1, %v351_v0  ;;  %v194_v11 = vsel %vm178_vm3, 1, %v351_v0  ;;  %v176_v12 = vld [vmem:[%s155_s15 + $0x38] sm:$0xff] }
  0x12   : > { %v197_v8 = vsel %vm181_vm4, 1, %v351_v0  ;;  %vm182_vm5 = vcmp.lt.f32.partialorder %v174_v9, 0.1  ;;  %v175_v13 = vld [vmem:[%s155_s15 + $0x30] sm:$0xff]  ;;  %vm184_vm6 = vcmp.lt.f32.partialorder %v176_v12, 0.1 }
  0x13   : > { %214 = vperm.xlu2 %342, %v197_v8   ;;  %v198_v14 = vsel %vm182_vm5, 1, %v351_v0  ;;  %vm183_vm7 = vcmp.lt.f32.partialorder %v175_v13, 0.1  ;;  %v200_v15 = vsel %vm184_vm6, 1, %v351_v0  ;;  %v189_v17 = vld [vmem:[%s385_s18 + $0x20] sm:$0xff]  ;;  %v190_v20 = vld [vmem:[%s385_s18 + $0x28] sm:$0xff] }
  0x14   : > { %v199_v16 = vsel %vm183_vm7, 1, %v351_v0  ;;  %v187_v23 = vld [vmem:[%s385_s18 + $0x10] sm:$0xff]  ;;  %v185_v24 = vld [vmem:[%s385_s18] sm:$0xff]  ;;  %v188_v29 = vld [vmem:[%s385_s18 + $0x18] sm:$0xff] }
  0x15   : > { %v186_v30 = vld [vmem:[%s385_s18 + $0x8] sm:$0xff]  ;;  %v192_v35 = vld [vmem:[%s385_s18 + $0x38] sm:$0xff]  ;;  %v191_v36 = vld [vmem:[%s385_s18 + $0x30] sm:$0xff] }
  0x19   : > { %211 = vperm.xlu1 %341, %v196_v10   ;;  %205 = vperm.xlu0 %340, %v194_v11  }
  0x1b   : > { %217 = vperm.xlu2 %342, %v198_v14  }
  0x21   : > { %223 = vperm.xlu1 %341, %v200_v15   ;;  %220 = vperm.xlu0 %340, %v199_v16  }
  0x6d   : > { %v215_v18 = vpop.permute.xlu2 %214 }
  0x6e   : > { %vm229_vm8 = vcmp.eq.s32.totalorder %v215_v18, 1 }
  0x6f   : > { %v237_v19 = vsel %vm229_vm8, -inf, %v189_v17 }
  0x70   : > { %246 = vst.msk [vmem:[%s392_s21 + $0x20] sm:$0xff] %vm241_vm9, %v237_v19 }
  0x75   : > { %v218_v21 = vpop.permute.xlu2 %217 }
  0x76   : > { %vm230_vm10 = vcmp.eq.s32.totalorder %v218_v21, 1 }
  0x77   : > { %v238_v22 = vsel %vm230_vm10, -inf, %v190_v20 }
  0x78   : > { %247 = vst.msk [vmem:[%s392_s21 + $0x28] sm:$0xff] %vm241_vm9, %v238_v22 }
  0x83   : > { %v209_v25 = vpop.permute.xlu1 %208  ;;  %v203_v26 = vpop.permute.xlu0 %202 }
  0x84   : > { %vm227_vm11 = vcmp.eq.s32.totalorder %v209_v25, 1  ;;  %vm225_vm12 = vcmp.eq.s32.totalorder %v203_v26, 1 }
  0x85   : > { %v235_v27 = vsel %vm227_vm11, -inf, %v187_v23  ;;  %v233_v28 = vsel %vm225_vm12, -inf, %v185_v24 }
  0x86   : > { %244 = vst.msk [vmem:[%s392_s21 + $0x10] sm:$0xff] %vm241_vm9, %v235_v27 }
  0x87   : > { %242 = vst.msk [vmem:[%s392_s21] sm:$0xff] %vm241_vm9, %v233_v28 }
  0x8b   : > { %v212_v31 = vpop.permute.xlu1 %211  ;;  %v206_v32 = vpop.permute.xlu0 %205 }
  0x8c   : > { %vm228_vm13 = vcmp.eq.s32.totalorder %v212_v31, 1  ;;  %vm226_vm14 = vcmp.eq.s32.totalorder %v206_v32, 1 }
  0x8d   : > { %v236_v33 = vsel %vm228_vm13, -inf, %v188_v29  ;;  %v234_v34 = vsel %vm226_vm14, -inf, %v186_v30 }
  0x8e   : > { %245 = vst.msk [vmem:[%s392_s21 + $0x18] sm:$0xff] %vm241_vm9, %v236_v33 }
  0x8f   : > { %243 = vst.msk [vmem:[%s392_s21 + $0x8] sm:$0xff] %vm241_vm9, %v234_v34 }
  0x93   : > { %v224_v37 = vpop.permute.xlu1 %223  ;;  %v221_v38 = vpop.permute.xlu0 %220 }
  0x94   : > { %vm232_vm15 = vcmp.eq.s32.totalorder %v224_v37, 1  ;;  %vm231_vm0 = vcmp.eq.s32.totalorder %v221_v38, 1 }
  0x95   : > { %v240_v39 = vsel %vm232_vm15, -inf, %v192_v35  ;;  %v239_v40 = vsel %vm231_vm0, -inf, %v191_v36 }
  0x96   : > { %249 = vst.msk [vmem:[%s392_s21 + $0x38] sm:$0xff] %vm241_vm9, %v240_v39 }
  0x97   : > { %248 = vst.msk [vmem:[%s392_s21 + $0x30] sm:$0xff] %vm241_vm9, %v239_v40 }
  0x98 PF: > { %s12_s9 = sadd.s32 1, %s349_s9  }
  0x99   : > { %p9_p4 = scmp.ge.s32.totalorder %s12_s9, 4  }
  0x9b   :  { %11 = sbr.rel (!%p9_p4) target bundleno = 1 (0x1), region = 61 }

</bundles_post_ra>
